<compile_context>
chip_gen: v7x
topology: tpu7x:2x2x1
jax: 0.10.0
libtpu: 0.0.40
codegen_flags: <defaults>
</compile_context>

<pallas_src>
import jax
import jax.numpy as jnp
from jax.experimental import pallas as pl
from jax.experimental.pallas import tpu as pltpu


def _linear_kernel(x_ref, w_ref, b_ref, o_ref):
    # x_ref: (TM, Fk), w_ref: (Fk, Ok), b_ref: (1, Ok), o_ref: (TM, Ok)
    acc = jnp.dot(x_ref[...], w_ref[...], preferred_element_type=jnp.float32)
    o_ref[...] = (acc + b_ref[...]).astype(o_ref.dtype)


def _padded_lanes(n):
    return ((n + 127) // 128) * 128


def logistic_regression_forward(x, w_t, b, *, vmem_budget_bytes=8 * 1024 * 1024):
    """Forward pass of nn.Linear(num_features, 2).

    x:   (B, F)   activations (f32 or bf16)
    w_t: (F, OUT) transposed nn.Linear weight
    b:   (OUT,)   bias
    """
    B, F = x.shape
    out_features = w_t.shape[1]

    # ---- Lane-density packing (free reshape, identical HBM bytes) -----------
    pack = 1
    if F <= 128 and 128 % F == 0:
        cand = 128 // F
        if cand > 1 and B % cand == 0:
            pack = cand

    if pack > 1:
        x_k = x.reshape(B // pack, pack * F)
        # Block-diagonal replicated weight:
        # w_k[i*F + f, j*OUT + o] = w_t[f, o] if i == j else 0
        eye = jnp.eye(pack, dtype=w_t.dtype)
        w_k = jnp.einsum("pq,fo->pfqo", eye, w_t).reshape(
            pack * F, pack * out_features
        )
        b_k = jnp.tile(b.reshape(1, out_features), (1, pack))
    else:
        x_k = x
        w_k = w_t
        b_k = b.reshape(1, out_features)

    Bk, Fk = x_k.shape
    Ok = w_k.shape[1]

    # ---- Tile size from the VMEM budget (double-buffered x + out blocks) ----
    itemsize = jnp.dtype(x.dtype).itemsize
    bytes_per_row = 2 * itemsize * (_padded_lanes(Fk) + _padded_lanes(Ok))
    tm_max = max(8, (vmem_budget_bytes // bytes_per_row) // 8 * 8)

    if Bk <= tm_max:
        # Small-problem fast path: one grid step, whole arrays VMEM-resident.
        tm = Bk
        grid = (1,)
    else:
        # Even number of large tiles (>=2): splits evenly across both v7x TCs,
        # and each step's DMA comfortably covers the fixed per-step overhead.
        n_tiles = pl.cdiv(Bk, tm_max)
        if n_tiles % 2:
            n_tiles += 1
        tm = (Bk + n_tiles - 1) // n_tiles
        tm = max(8, ((tm + 7) // 8) * 8)
        grid = (pl.cdiv(Bk, tm),)

    out_k = pl.pallas_call(
        _linear_kernel,
        out_shape=jax.ShapeDtypeStruct((Bk, Ok), x.dtype),
        grid=grid,
        in_specs=[
            # x streams tile-by-tile over the (packed) batch, double-buffered.
            pl.BlockSpec((tm, Fk), lambda i: (i, 0)),
            # Weight and bias: constant block index -> VMEM-resident across tiles.
            pl.BlockSpec((Fk, Ok), lambda i: (0, 0)),
            pl.BlockSpec((1, Ok), lambda i: (0, 0)),
        ],
        out_specs=pl.BlockSpec((tm, Ok), lambda i: (i, 0)),
        compiler_params=pltpu.CompilerParams(
            dimension_semantics=("parallel",),
        ),
    )(x_k, w_k, b_k)

    if pack > 1:
        return out_k.reshape(B, out_features)
    return out_k


if __name__ == "__main__":
    key = jax.random.PRNGKey(0)
    kx, kw, kb, kx2 = jax.random.split(key, 4)

    batch = 1024
    num_features = 32
    out_features = 2

    # Deterministic PyTorch-style init (uniform bound = 1/sqrt(fan_in)).
    bound = 1.0 / (num_features**0.5)
    weight = jax.random.uniform(
        kw, (out_features, num_features), jnp.float32, -bound, bound
    )  # nn.Linear weight layout: (out_features, num_features)
    bias = jax.random.uniform(kb, (out_features,), jnp.float32, -bound, bound)
    w_t = weight.T  # (num_features, out_features)

    x = jax.random.normal(kx, (batch, num_features), jnp.float32)

    # 1) Main run: lane-packed, single-tile fast path.
    out = jax.block_until_ready(logistic_regression_forward(x, w_t, bias))
    ref = x @ weight.T + bias
    assert out.shape == (batch, out_features)
    assert jnp.allclose(out, ref, atol=1e-5, rtol=1e-5)

    # 2) Force the multi-tile grid path (tiny VMEM budget) to validate tiling
    #    and the even-tile selection without needing a huge batch.
    out_tiled = jax.block_until_ready(
        logistic_regression_forward(x, w_t, bias, vmem_budget_bytes=64 * 1024)
    )
    assert jnp.allclose(out_tiled, ref, atol=1e-5, rtol=1e-5)

    # 3) Non-pack-friendly feature count exercises the plain-layout fallback.
    nf2 = 24
    bound2 = 1.0 / (nf2**0.5)
    w2 = jax.random.uniform(kw, (out_features, nf2), jnp.float32, -bound2, bound2)
    b2 = jax.random.uniform(kb, (out_features,), jnp.float32, -bound2, bound2)
    x2 = jax.random.normal(kx2, (64, nf2), jnp.float32)
    out2 = jax.block_until_ready(logistic_regression_forward(x2, w2.T, b2))
    assert jnp.allclose(out2, x2 @ w2.T + b2, atol=1e-5, rtol=1e-5)

    print("KERNEL_OK")
</pallas_src>

<mosaic_0001>
module attributes {stable_mosaic.version = 11 : i64} {
  func.func @_linear_kernel(%arg0: i32, %arg1: memref<256x128xf32, #tpu.memory_space<vmem>>, %arg2: memref<128x8xf32, #tpu.memory_space<vmem>>, %arg3: memref<1x8xf32, #tpu.memory_space<vmem>>, %arg4: memref<256x8xf32, #tpu.memory_space<vmem>>) attributes {dimension_semantics = [#tpu.dimension_semantics<parallel>], iteration_bounds = array<i64: 1>, scalar_prefetch = 0 : i64, scratch_operands = 0 : i64, tpu.core_type = #tpu.core_type<tc>, window_params = [{transform_indices = @transform_0, window_bounds = array<i64: 256, 128>}, {pipeline_mode = #tpu.pipeline_mode<synchronous>, transform_indices = @transform_1, window_bounds = array<i64: 128, 8>}, {pipeline_mode = #tpu.pipeline_mode<synchronous>, transform_indices = @transform_2, window_bounds = array<i64: 1, 8>}, {transform_indices = @transform_3, window_bounds = array<i64: 256, 8>}]} {
    %c0 = arith.constant 0 : index
    %c0_0 = arith.constant 0 : index
    %0 = vector.load %arg1[%c0, %c0_0] : memref<256x128xf32, #tpu.memory_space<vmem>>, vector<256x128xf32>
    %c0_1 = arith.constant 0 : index
    %c0_2 = arith.constant 0 : index
    %1 = vector.load %arg2[%c0_1, %c0_2] : memref<128x8xf32, #tpu.memory_space<vmem>>, vector<128x8xf32>
    %cst = arith.constant dense<0.000000e+00> : vector<256x8xf32>
    %2 = tpu.matmul %0, %1, %cst {dimension_numbers = #tpu.dot_dimension_numbers<[1], [0], [0], [1], [0, 0, 1, 1], [], []>} : vector<256x128xf32>, vector<128x8xf32>, vector<256x8xf32> -> vector<256x8xf32>
    %c0_3 = arith.constant 0 : index
    %c0_4 = arith.constant 0 : index
    %3 = vector.load %arg3[%c0_3, %c0_4] : memref<1x8xf32, #tpu.memory_space<vmem>>, vector<1x8xf32>
    %4 = vector.broadcast %3 : vector<1x8xf32> to vector<256x8xf32>
    %5 = arith.addf %2, %4 : vector<256x8xf32>
    %c0_5 = arith.constant 0 : index
    %c0_6 = arith.constant 0 : index
    %6 = vector.load %arg4[%c0_5, %c0_6] : memref<256x8xf32, #tpu.memory_space<vmem>>, vector<256x8xf32>
    tpu.vector_store %arg4[%c0_5, %c0_6], %5 {strides = array<i32>} : memref<256x8xf32, #tpu.memory_space<vmem>>, vector<256x8xf32>,
    return
  }
  func.func @transform_0(%arg0: i32) -> (i32, i32) {
    %c0_i32 = arith.constant 0 : i32
    %c0_i32_0 = arith.constant 0 : i32
    return %arg0, %c0_i32 : i32, i32
  }
  func.func @transform_1(%arg0: i32) -> (i32, i32) {
    %c0_i32 = arith.constant 0 : i32
    %c0_i32_0 = arith.constant 0 : i32
    %c0_i32_1 = arith.constant 0 : i32
    return %c0_i32, %c0_i32_0 : i32, i32
  }
  func.func @transform_2(%arg0: i32) -> (i32, i32) {
    %c0_i32 = arith.constant 0 : i32
    %c0_i32_0 = arith.constant 0 : i32
    %c0_i32_1 = arith.constant 0 : i32
    return %c0_i32, %c0_i32_0 : i32, i32
  }
  func.func @transform_3(%arg0: i32) -> (i32, i32) {
    %c0_i32 = arith.constant 0 : i32
    %c0_i32_0 = arith.constant 0 : i32
    return %arg0, %c0_i32 : i32, i32
  }
}

</mosaic_0001>

<bundles_post_ra>
// kernel: tpu_custom_call.1
= control target key start
LH: loop header
LB: loop body
LE: loop exit
PB: predicated region body
PF: predicated region fallthrough
CT: control target
= control target key end

     0   :  { %8 = vsyncpa [#allocation3], 0  ;;  %s550_s12 = smov [#allocation2]   ;;  %s798_s0 = inlined_call_operand.hbm [shape: f32[256,128], index: 0, kind: input, shape index: {}]   ;;  %s799_s1 = inlined_call_operand.vmem [shape: f32[128,8], index: 1, kind: input, shape index: {}]   ;;  %s800_s2 = inlined_call_operand.vmem [shape: f32[1,8], index: 2, kind: input, shape index: {}]   ;;  %s801_s3 = inlined_call_operand.vmem [shape: f32[256,8], index: 3, kind: output, shape index: {}]  }
   0x1   :  { %s14_s13 = sshll.u32 %s550_s12, 4  ;;  %s526_s16 = scalar_lea.hbm %s798_s0, 4096  ;;  %s15_s13 = int_to_ptr.vmem [resolvable:$true] %s14_s13 }
   0x2   :  { %p527_p0 = scmp.ne.s32.totalorder %s798_s0, %s526_s16  ;;  %p530_p1 = scmp.lt.u32.totalorder %s526_s16, %s798_s0 }
   0x4   :  { %p532_p2 = pnand %p530_p1, %p527_p0 }
   0x6   :  { %535 = shalt.err (!%p532_p2)
}
   0x7   :  { %s536_s21 = scalar_lea.vmem %s15_s13, 4096  ;;  %p541_p4 = scmp.lt.s32.totalorder %s15_s13, %s15_s13 }
   0x8   :  { %p537_p3 = scmp.ne.s32.totalorder %s15_s13, %s536_s21  ;;  %p542_p5 = scmp.lt.s32.totalorder %s536_s21, %s536_s21 }
   0xa   :  { %p543_p6 = por %p542_p5, %p541_p4 }
   0xc   :  { %p544_p7 = pnand %p543_p6, %p537_p3 }
   0xe   :  { %547 = shalt.err (!%p544_p7)
}
   0xf   :  { %s551_s22 = smov 128   ;;  %s552_s23 = smov 8  }
  0x10   :  { %20 = dma.hbm_to_vmem [thread:$0]  %s798_s0, 4096, %s15_s13, [#allocation3], %s551_s22, %s551_s22, %s552_s23  }
  0x11   :  { %548 = dma.done.wait [#allocation3], 4096  }
  0x12   :  { %549 = vsyncadd [#allocation3], 4294963200  ;;  %v60_v0 = vld [vmem:[%s799_s1] sm:$0xff]  ;;  %v61_v1 = vld [vmem:[%s799_s1 + $0x8] sm:$0xff]  ;;  %vm308_vm0 = vcmask 64512  }
  0x13   :  { %v62_v2 = vld [vmem:[%s799_s1 + $0x10] sm:$0xff]  ;;  %v475_v3 = vpack.c.bf16 %v61_v1, %v60_v0  ;;  %v63_v4 = vld [vmem:[%s799_s1 + $0x18] sm:$0xff]  ;;  %v64_v6 = vld [vmem:[%s799_s1 + $0x20] sm:$0xff] }
  0x14   :  { %v479_v5 = vpack.c.bf16 %v63_v4, %v62_v2  ;;  %v65_v7 = vld [vmem:[%s799_s1 + $0x28] sm:$0xff]  ;;  %v28_v9 = vld [vmem:[#allocation2] sm:$0xff]  ;;  %v66_v11 = vld [vmem:[%s799_s1 + $0x30] sm:$0xff] }
  0x15   :  { %476 = vmatprep.subr.bf16.mxu0 %v475_v3  ;;  %507 = vmatprep.subr.bf16.mxu1 %v475_v3  ;;  %v483_v8 = vpack.c.bf16 %v65_v7, %v64_v6  ;;  %v44_v10 = vld [vmem:[#allocation2 + $0x80] sm:$0xff]  ;;  %v67_v12 = vld [vmem:[%s799_s1 + $0x38] sm:$0xff]  ;;  %v69_v15 = vld [vmem:[%s799_s1 + $0x48] sm:$0xff] }
  0x16   :  { %478 = vmatpush3.bf16.msra.mxu0 %v475_v3  ;;  %515 = vmatpush3.bf16.msra.mxu1 %v475_v3  ;;  %v487_v13 = vpack.c.bf16 %v67_v12, %v66_v11  ;;  %v68_v14 = vld [vmem:[%s799_s1 + $0x40] sm:$0xff]  ;;  %v70_v17 = vld [vmem:[%s799_s1 + $0x50] sm:$0xff]  ;;  %v71_v18 = vld [vmem:[%s799_s1 + $0x58] sm:$0xff] }
  0x17   :  { %480 = vmatprep.subr.bf16.mxu0 %v479_v5  ;;  %508 = vmatprep.subr.bf16.mxu1 %v479_v5  ;;  %v491_v16 = vpack.c.bf16 %v69_v15, %v68_v14  ;;  %v495_v19 = vpack.c.bf16 %v71_v18, %v70_v17  ;;  %v72_v20 = vld [vmem:[%s799_s1 + $0x60] sm:$0xff]  ;;  %v73_v21 = vld [vmem:[%s799_s1 + $0x68] sm:$0xff]  ;;  %v74_v23 = vld [vmem:[%s799_s1 + $0x70] sm:$0xff] }
  0x18   :  { %427 = vmatprep.mubr.f32.mxu0 %v28_v9  ;;  %451 = vmatprep.mubr.f32.mxu1 %v44_v10  ;;  %v499_v22 = vpack.c.bf16 %v73_v21, %v72_v20  ;;  %v75_v24 = vld [vmem:[%s799_s1 + $0x78] sm:$0xff]  ;;  %v29_v26 = vld [vmem:[#allocation2 + $0x8] sm:$0xff]  ;;  %v30_v28 = vld [vmem:[#allocation2 + $0x10] sm:$0xff] }
  0x19   :  { %v503_v25 = vpack.c.bf16 %v75_v24, %v74_v23  ;;  %v45_v27 = vld [vmem:[#allocation2 + $0x88] sm:$0xff]  ;;  %v46_v29 = vld [vmem:[#allocation2 + $0x90] sm:$0xff]  ;;  %v31_v30 = vld [vmem:[#allocation2 + $0x18] sm:$0xff] }
  0x1a   :  { %482 = vmatpush3.bf16.msra.mxu0 %v479_v5  ;;  %516 = vmatpush3.bf16.msra.mxu1 %v479_v5  ;;  %v47_v31 = vld [vmem:[#allocation2 + $0x98] sm:$0xff]  ;;  %v32_v32 = vld [vmem:[#allocation2 + $0x20] sm:$0xff]  ;;  %v33_v34 = vld [vmem:[#allocation2 + $0x28] sm:$0xff] }
  0x1b   :  { %484 = vmatprep.subr.bf16.mxu0 %v483_v8  ;;  %509 = vmatprep.subr.bf16.mxu1 %v483_v8  ;;  %v48_v33 = vld [vmem:[#allocation2 + $0xa0] sm:$0xff]  ;;  %v49_v35 = vld [vmem:[#allocation2 + $0xa8] sm:$0xff]  ;;  %v34_v36 = vld [vmem:[#allocation2 + $0x30] sm:$0xff] }
  0x1c   :  { %v50_v37 = vld [vmem:[#allocation2 + $0xb0] sm:$0xff]  ;;  %v35_v38 = vld [vmem:[#allocation2 + $0x38] sm:$0xff]  ;;  %v36_v40 = vld [vmem:[#allocation2 + $0x40] sm:$0xff] }
  0x1d   :  { %v51_v39 = vld [vmem:[#allocation2 + $0xb8] sm:$0xff]  ;;  %v52_v41 = vld [vmem:[#allocation2 + $0xc0] sm:$0xff]  ;;  %v37_v42 = vld [vmem:[#allocation2 + $0x48] sm:$0xff] }
  0x1e   :  { %486 = vmatpush3.bf16.msra.mxu0 %v483_v8  ;;  %517 = vmatpush3.bf16.msra.mxu1 %v483_v8  ;;  %v53_v43 = vld [vmem:[#allocation2 + $0xc8] sm:$0xff]  ;;  %v38_v44 = vld [vmem:[#allocation2 + $0x50] sm:$0xff]  ;;  %v39_v46 = vld [vmem:[#allocation2 + $0x58] sm:$0xff] }
  0x1f   :  { %488 = vmatprep.subr.bf16.mxu0 %v487_v13  ;;  %510 = vmatprep.subr.bf16.mxu1 %v487_v13  ;;  %v54_v45 = vld [vmem:[#allocation2 + $0xd0] sm:$0xff]  ;;  %v55_v47 = vld [vmem:[#allocation2 + $0xd8] sm:$0xff]  ;;  %v40_v48 = vld [vmem:[#allocation2 + $0x60] sm:$0xff] }
  0x20   :  { %v56_v49 = vld [vmem:[#allocation2 + $0xe0] sm:$0xff]  ;;  %v41_v50 = vld [vmem:[#allocation2 + $0x68] sm:$0xff]  ;;  %v42_v52 = vld [vmem:[#allocation2 + $0x70] sm:$0xff] }
  0x21   :  { %v57_v51 = vld [vmem:[#allocation2 + $0xe8] sm:$0xff]  ;;  %v58_v53 = vld [vmem:[#allocation2 + $0xf0] sm:$0xff]  ;;  %v43_v54 = vld [vmem:[#allocation2 + $0x78] sm:$0xff] }
  0x22   :  { %490 = vmatpush3.bf16.msra.mxu0 %v487_v13  ;;  %518 = vmatpush3.bf16.msra.mxu1 %v487_v13  ;;  %v59_v55 = vld [vmem:[#allocation2 + $0xf8] sm:$0xff]  ;;  %v636_v56 = vld [vmem:[%s800_s2] ss:$0 sm:$0xff] }
  0x23   :  { %492 = vmatprep.subr.bf16.mxu0 %v491_v16  ;;  %511 = vmatprep.subr.bf16.mxu1 %v491_v16 }
  0x26   :  { %494 = vmatpush3.bf16.msra.mxu0 %v491_v16  ;;  %519 = vmatpush3.bf16.msra.mxu1 %v491_v16 }
  0x27   :  { %496 = vmatprep.subr.bf16.mxu0 %v495_v19  ;;  %512 = vmatprep.subr.bf16.mxu1 %v495_v19 }
  0x2a   :  { %498 = vmatpush3.bf16.msra.mxu0 %v495_v19  ;;  %520 = vmatpush3.bf16.msra.mxu1 %v495_v19 }
  0x2b   :  { %500 = vmatprep.subr.bf16.mxu0 %v499_v22  ;;  %513 = vmatprep.subr.bf16.mxu1 %v499_v22 }
  0x2e   :  { %502 = vmatpush3.bf16.msra.mxu0 %v499_v22  ;;  %521 = vmatpush3.bf16.msra.mxu1 %v499_v22 }
  0x2f   :  { %504 = vmatprep.subr.bf16.mxu0 %v503_v25  ;;  %514 = vmatprep.subr.bf16.mxu1 %v503_v25 }
  0x32   :  { %506 = vmatpush3.bf16.msra.mxu0 %v503_v25  ;;  %522 = vmatpush3.bf16.msra.mxu1 %v503_v25 }
  0x35   :  { %428 = vmatmul.mubr.f32.vlgmr.msra.gmra.mrb[0].mxu0 %v29_v26  ;;  %452 = vmatmul.mubr.f32.vlgmr.msra.gmra.mrb[0].mxu1 %v45_v27 }
  0x36   :  { %430 = vmatprep.mubr.f32.mxu0 %v30_v28  ;;  %454 = vmatprep.mubr.f32.mxu1 %v46_v29 }
  0x39   :  { %431 = vmatmul.mubr.f32.gmra.mrb[2].mxu0 %v31_v30  ;;  %455 = vmatmul.mubr.f32.gmra.mrb[2].mxu1 %v47_v31 }
  0x3a   :  { %433 = vmatprep.mubr.f32.mxu0 %v32_v32  ;;  %457 = vmatprep.mubr.f32.mxu1 %v48_v33 }
  0x3d   :  { %434 = vmatmul.mubr.f32.gmra.mrb[4].mxu0 %v33_v34  ;;  %458 = vmatmul.mubr.f32.gmra.mrb[4].mxu1 %v49_v35 }
  0x3e   :  { %436 = vmatprep.mubr.f32.mxu0 %v34_v36  ;;  %460 = vmatprep.mubr.f32.mxu1 %v50_v37 }
  0x41   :  { %437 = vmatmul.mubr.f32.gmra.mrb[6].mxu0 %v35_v38  ;;  %461 = vmatmul.mubr.f32.gmra.mrb[6].mxu1 %v51_v39 }
  0x42   :  { %439 = vmatprep.mubr.f32.mxu0 %v36_v40  ;;  %463 = vmatprep.mubr.f32.mxu1 %v52_v41 }
  0x45   :  { %440 = vmatmul.mubr.f32.gmra.mrb[8].mxu0 %v37_v42  ;;  %464 = vmatmul.mubr.f32.gmra.mrb[8].mxu1 %v53_v43 }
  0x46   :  { %442 = vmatprep.mubr.f32.mxu0 %v38_v44  ;;  %466 = vmatprep.mubr.f32.mxu1 %v54_v45 }
  0x49   :  { %443 = vmatmul.mubr.f32.gmra.mrb[10].mxu0 %v39_v46  ;;  %467 = vmatmul.mubr.f32.gmra.mrb[10].mxu1 %v55_v47 }
  0x4a   :  { %445 = vmatprep.mubr.f32.mxu0 %v40_v48  ;;  %469 = vmatprep.mubr.f32.mxu1 %v56_v49 }
  0x4d   :  { %446 = vmatmul.mubr.f32.gmra.mrb[12].mxu0 %v41_v50  ;;  %470 = vmatmul.mubr.f32.gmra.mrb[12].mxu1 %v57_v51 }
  0x4e   :  { %448 = vmatprep.mubr.f32.mxu0 %v42_v52  ;;  %472 = vmatprep.mubr.f32.mxu1 %v58_v53 }
  0x51   :  { %449 = vmatmul.mubr.f32.gmra.mrb[14].mxu0 %v43_v54  ;;  %473 = vmatmul.mubr.f32.gmra.mrb[14].mxu1 %v59_v55 }
 0x108   :  { %v429_v57 = vpop.f32.mrb[0].mxu0  ;;  %v453_v58 = vpop.f32.mrb[0].mxu1 }
 0x109   :  { %v155_v59 = vadd.f32 %v429_v57, %v636_v56  ;;  %v235_v60 = vadd.f32 %v453_v58, %v636_v56  ;;  %v149_v61 = vpop.f32.mrb[1].mxu0  ;;  %v229_v62 = vpop.f32.mrb[1].mxu1 }
 0x10a   :  { %v150_v63 = vadd.f32 %v636_v56, %v149_v61  ;;  %v230_v0 = vadd.f32 %v636_v56, %v229_v62 }
 0x10b   :  { %310 = vst.msk [vmem:[%s801_s3 + $0x8] sm:$0xff] %vm308_vm0, %v155_v59  ;;  %326 = vst.msk [vmem:[%s801_s3 + $0x88] sm:$0xff] %vm308_vm0, %v235_v60 }
 0x10c   :  { %309 = vst.msk [vmem:[%s801_s3] sm:$0xff] %vm308_vm0, %v150_v63  ;;  %325 = vst.msk [vmem:[%s801_s3 + $0x80] sm:$0xff] %vm308_vm0, %v230_v0  ;;  %v432_v1 = vpop.f32.mrb[2].mxu0  ;;  %v456_v2 = vpop.f32.mrb[2].mxu1 }
 0x10d   :  { %v165_v3 = vadd.f32 %v432_v1, %v636_v56  ;;  %v245_v4 = vadd.f32 %v456_v2, %v636_v56  ;;  %v159_v5 = vpop.f32.mrb[3].mxu0  ;;  %v239_v6 = vpop.f32.mrb[3].mxu1 }
 0x10e   :  { %v160_v7 = vadd.f32 %v636_v56, %v159_v5  ;;  %v240_v8 = vadd.f32 %v636_v56, %v239_v6 }
 0x10f   :  { %312 = vst.msk [vmem:[%s801_s3 + $0x18] sm:$0xff] %vm308_vm0, %v165_v3  ;;  %328 = vst.msk [vmem:[%s801_s3 + $0x98] sm:$0xff] %vm308_vm0, %v245_v4 }
 0x110   :  { %311 = vst.msk [vmem:[%s801_s3 + $0x10] sm:$0xff] %vm308_vm0, %v160_v7  ;;  %327 = vst.msk [vmem:[%s801_s3 + $0x90] sm:$0xff] %vm308_vm0, %v240_v8  ;;  %v435_v9 = vpop.f32.mrb[4].mxu0  ;;  %v459_v10 = vpop.f32.mrb[4].mxu1 }
 0x111   :  { %v175_v11 = vadd.f32 %v435_v9, %v636_v56  ;;  %v255_v12 = vadd.f32 %v459_v10, %v636_v56  ;;  %v169_v13 = vpop.f32.mrb[5].mxu0  ;;  %v249_v14 = vpop.f32.mrb[5].mxu1 }
 0x112   :  { %v170_v15 = vadd.f32 %v636_v56, %v169_v13  ;;  %v250_v16 = vadd.f32 %v636_v56, %v249_v14 }
 0x113   :  { %314 = vst.msk [vmem:[%s801_s3 + $0x28] sm:$0xff] %vm308_vm0, %v175_v11  ;;  %330 = vst.msk [vmem:[%s801_s3 + $0xa8] sm:$0xff] %vm308_vm0, %v255_v12 }
 0x114   :  { %313 = vst.msk [vmem:[%s801_s3 + $0x20] sm:$0xff] %vm308_vm0, %v170_v15  ;;  %329 = vst.msk [vmem:[%s801_s3 + $0xa0] sm:$0xff] %vm308_vm0, %v250_v16  ;;  %v438_v17 = vpop.f32.mrb[6].mxu0  ;;  %v462_v18 = vpop.f32.mrb[6].mxu1 }
 0x115   :  { %v185_v19 = vadd.f32 %v438_v17, %v636_v56  ;;  %v265_v20 = vadd.f32 %v462_v18, %v636_v56  ;;  %v179_v21 = vpop.f32.mrb[7].mxu0  ;;  %v259_v22 = vpop.f32.mrb[7].mxu1 }
 0x116   :  { %v180_v23 = vadd.f32 %v636_v56, %v179_v21  ;;  %v260_v24 = vadd.f32 %v636_v56, %v259_v22 }
 0x117   :  { %316 = vst.msk [vmem:[%s801_s3 + $0x38] sm:$0xff] %vm308_vm0, %v185_v19  ;;  %332 = vst.msk [vmem:[%s801_s3 + $0xb8] sm:$0xff] %vm308_vm0, %v265_v20 }
 0x118   :  { %315 = vst.msk [vmem:[%s801_s3 + $0x30] sm:$0xff] %vm308_vm0, %v180_v23  ;;  %331 = vst.msk [vmem:[%s801_s3 + $0xb0] sm:$0xff] %vm308_vm0, %v260_v24  ;;  %v441_v25 = vpop.f32.mrb[8].mxu0  ;;  %v465_v26 = vpop.f32.mrb[8].mxu1 }
 0x119   :  { %v195_v27 = vadd.f32 %v441_v25, %v636_v56  ;;  %v275_v28 = vadd.f32 %v465_v26, %v636_v56  ;;  %v189_v29 = vpop.f32.mrb[9].mxu0  ;;  %v269_v30 = vpop.f32.mrb[9].mxu1 }
 0x11a   :  { %v190_v31 = vadd.f32 %v636_v56, %v189_v29  ;;  %v270_v32 = vadd.f32 %v636_v56, %v269_v30 }
 0x11b   :  { %318 = vst.msk [vmem:[%s801_s3 + $0x48] sm:$0xff] %vm308_vm0, %v195_v27  ;;  %334 = vst.msk [vmem:[%s801_s3 + $0xc8] sm:$0xff] %vm308_vm0, %v275_v28 }
 0x11c   :  { %317 = vst.msk [vmem:[%s801_s3 + $0x40] sm:$0xff] %vm308_vm0, %v190_v31  ;;  %333 = vst.msk [vmem:[%s801_s3 + $0xc0] sm:$0xff] %vm308_vm0, %v270_v32  ;;  %v444_v33 = vpop.f32.mrb[10].mxu0  ;;  %v468_v34 = vpop.f32.mrb[10].mxu1 }
 0x11d   :  { %v205_v35 = vadd.f32 %v444_v33, %v636_v56  ;;  %v285_v36 = vadd.f32 %v468_v34, %v636_v56  ;;  %v199_v37 = vpop.f32.mrb[11].mxu0  ;;  %v279_v38 = vpop.f32.mrb[11].mxu1 }
 0x11e   :  { %v200_v39 = vadd.f32 %v636_v56, %v199_v37  ;;  %v280_v40 = vadd.f32 %v636_v56, %v279_v38 }
 0x11f   :  { %320 = vst.msk [vmem:[%s801_s3 + $0x58] sm:$0xff] %vm308_vm0, %v205_v35  ;;  %336 = vst.msk [vmem:[%s801_s3 + $0xd8] sm:$0xff] %vm308_vm0, %v285_v36 }
 0x120   :  { %319 = vst.msk [vmem:[%s801_s3 + $0x50] sm:$0xff] %vm308_vm0, %v200_v39  ;;  %335 = vst.msk [vmem:[%s801_s3 + $0xd0] sm:$0xff] %vm308_vm0, %v280_v40  ;;  %v447_v41 = vpop.f32.mrb[12].mxu0  ;;  %v471_v42 = vpop.f32.mrb[12].mxu1 }
 0x121   :  { %v215_v43 = vadd.f32 %v447_v41, %v636_v56  ;;  %v295_v44 = vadd.f32 %v471_v42, %v636_v56  ;;  %v209_v45 = vpop.f32.mrb[13].mxu0  ;;  %v289_v46 = vpop.f32.mrb[13].mxu1 }
 0x122   :  { %v210_v47 = vadd.f32 %v636_v56, %v209_v45  ;;  %v290_v48 = vadd.f32 %v636_v56, %v289_v46 }
 0x123   :  { %322 = vst.msk [vmem:[%s801_s3 + $0x68] sm:$0xff] %vm308_vm0, %v215_v43  ;;  %338 = vst.msk [vmem:[%s801_s3 + $0xe8] sm:$0xff] %vm308_vm0, %v295_v44 }
 0x124   :  { %321 = vst.msk [vmem:[%s801_s3 + $0x60] sm:$0xff] %vm308_vm0, %v210_v47  ;;  %337 = vst.msk [vmem:[%s801_s3 + $0xe0] sm:$0xff] %vm308_vm0, %v290_v48  ;;  %v450_v49 = vpop.f32.mrb[14].mxu0  ;;  %v474_v50 = vpop.f32.mrb[14].mxu1 }
 0x125   :  { %v225_v51 = vadd.f32 %v450_v49, %v636_v56  ;;  %v305_v52 = vadd.f32 %v474_v50, %v636_v56  ;;  %v219_v53 = vpop.f32.mrb[15].mxu0  ;;  %v299_v54 = vpop.f32.mrb[15].mxu1 }
 0x126   :  { %v220_v55 = vadd.f32 %v636_v56, %v219_v53  ;;  %v300_v57 = vadd.f32 %v636_v56, %v299_v54 }
 0x127   :  { %324 = vst.msk [vmem:[%s801_s3 + $0x78] sm:$0xff] %vm308_vm0, %v225_v51  ;;  %340 = vst.msk [vmem:[%s801_s3 + $0xf8] sm:$0xff] %vm308_vm0, %v305_v52 }
 0x128   :  { %323 = vst.msk [vmem:[%s801_s3 + $0x70] sm:$0xff] %vm308_vm0, %v220_v55  ;;  %339 = vst.msk [vmem:[%s801_s3 + $0xf0] sm:$0xff] %vm308_vm0, %v300_v57 }
 0x129   :  { %345 = vsyncpa [#allocation3], 1 }

</bundles_post_ra>
